<compile_context>
chip_gen: v7x
topology: tpu7x:2x2x1
jax: 0.10.0
libtpu: 0.0.40
codegen_flags: <defaults>
</compile_context>

<pallas_src>
import jax
import jax.numpy as jnp
from jax.experimental import pallas as pl
from jax.experimental.pallas import tpu as pltpu

LANES = 128  # keep num within a single lane vector


def _awl_kernel(packed_ref, out_ref):
    # packed_ref: (2, num) f32 in VMEM. Row 0 = losses, row 1 = params.
    l = packed_ref[0:1, :]          # (1, num)
    p = packed_ref[1:2, :]          # (1, num)
    p2 = p * p
    # 0.5 / p^2 * loss  +  log(1 + p^2)
    term = 0.5 * l * pl.reciprocal(p2, approx=False) + jnp.log1p(p2)
    # Mosaic's reduce is masked to the logical (1, num) extent, so physical
    # lane padding cannot leak into the sum.
    out_ref[0, 0] = jnp.sum(term)


def _awl_forward(losses, params):
    num = params.shape[0]
    assert losses.shape[0] == num
    assert num <= LANES, "AutomaticWeightedLoss Pallas kernel supports num <= 128"
    # Single stack, no padding: full-array BlockSpec handles the (2, num) tile.
    packed = jnp.stack([losses.astype(jnp.float32), params.astype(jnp.float32)])
    out = pl.pallas_call(
        _awl_kernel,
        out_shape=jax.ShapeDtypeStruct((1, 1), jnp.float32),
        in_specs=[pl.BlockSpec(memory_space=pltpu.MemorySpace.VMEM)],
        out_specs=pl.BlockSpec(memory_space=pltpu.MemorySpace.SMEM),
        cost_estimate=pl.CostEstimate(
            flops=6 * num,
            transcendentals=num,
            bytes_accessed=8 * num + 4,
        ),
    )(packed)
    return out[0, 0]


@jax.custom_vjp
def automatic_weighted_loss(losses, params):
    """losses: (num,), params: (num,) -> scalar f32."""
    return _awl_forward(losses, params)


def _awl_fwd(losses, params):
    return _awl_forward(losses, params), (losses, params)


def _awl_bwd(res, g):
    losses, params = res
    l = losses.astype(jnp.float32)
    p = params.astype(jnp.float32)
    p2 = p * p
    d_l = 0.5 / p2                                  # dL/d loss_i
    d_p = -l / (p2 * p) + 2.0 * p / (1.0 + p2)      # dL/d param_i
    return (g * d_l).astype(losses.dtype), (g * d_p).astype(params.dtype)


automatic_weighted_loss.defvjp(_awl_fwd, _awl_bwd)


def automatic_weighted_loss_ref(losses, params):
    p2 = params.astype(jnp.float32) ** 2
    return jnp.sum(0.5 / p2 * losses.astype(jnp.float32) + jnp.log1p(p2))


if __name__ == "__main__":
    num = 2
    # Deterministic parameter init, matching nn.Parameter(torch.ones(num)).
    params = jnp.ones((num,), jnp.float32)

    # Two synthetic scalar task losses (what the module's forward expects).
    key = jax.random.PRNGKey(0)
    k1, k2 = jax.random.split(key)
    loss1 = jnp.abs(jax.random.normal(k1, (), jnp.float32))
    loss2 = jnp.abs(jax.random.normal(k2, (), jnp.float32))
    losses = jnp.stack([loss1, loss2])

    out = jax.block_until_ready(automatic_weighted_loss(losses, params))
    ref = automatic_weighted_loss_ref(losses, params)
    assert jnp.allclose(out, ref, rtol=1e-5, atol=1e-5), (out, ref)

    # Gradient check: custom VJP vs. autodiff of the plain-jnp reference.
    g_l, g_p = jax.grad(automatic_weighted_loss, argnums=(0, 1))(losses, params)
    r_l, r_p = jax.grad(automatic_weighted_loss_ref, argnums=(0, 1))(losses, params)
    assert jnp.allclose(g_l, r_l, rtol=1e-5, atol=1e-5), (g_l, r_l)
    assert jnp.allclose(g_p, r_p, rtol=1e-5, atol=1e-5), (g_p, r_p)

    print("KERNEL_OK")
</pallas_src>

<mosaic_0001>
module attributes {stable_mosaic.version = 11 : i64} {
  func.func @_awl_kernel(%arg0: memref<2x2xf32, #tpu.memory_space<vmem>>, %arg1: memref<1x1xf32, #tpu.memory_space<smem>>) attributes {dimension_semantics = [], scalar_prefetch = 0 : i64, scratch_operands = 0 : i64, tpu.core_type = #tpu.core_type<tc>} {
    %c0 = arith.constant 0 : index
    %c0_0 = arith.constant 0 : index
    %0 = vector.load %arg0[%c0, %c0_0] : memref<2x2xf32, #tpu.memory_space<vmem>>, vector<1x2xf32>
    %c1 = arith.constant 1 : index
    %c0_1 = arith.constant 0 : index
    %1 = vector.load %arg0[%c1, %c0_1] : memref<2x2xf32, #tpu.memory_space<vmem>>, vector<1x2xf32>
    %2 = arith.mulf %1, %1 : vector<1x2xf32>
    %cst = arith.constant 5.000000e-01 : f32
    %3 = vector.broadcast %cst : f32 to vector<1x2xf32>
    %4 = arith.mulf %3, %0 : vector<1x2xf32>
    %5 = tpu.reciprocal %2 : vector<1x2xf32> -> vector<1x2xf32>
    %6 = arith.mulf %4, %5 : vector<1x2xf32>
    %7 = math.log1p %2 : vector<1x2xf32>
    %8 = arith.addf %6, %7 : vector<1x2xf32>
    %9 = vector.shape_cast %8 : vector<1x2xf32> to vector<1x1x2xf32>
    %cst_2 = arith.constant dense<0.000000e+00> : vector<1xf32>
    %10 = vector.multi_reduction <add>, %9, %cst_2 [1, 2] : vector<1x1x2xf32> to vector<1xf32>
    %11 = vector.shape_cast %10 : vector<1xf32> to vector<1x1x1xf32>
    %12 = vector.extract %11[0, 0, 0] : f32 from vector<1x1x1xf32>
    %c0_3 = arith.constant 0 : index
    %c0_4 = arith.constant 0 : index
    %13 = memref.load %arg1[%c0_3, %c0_4] : memref<1x1xf32, #tpu.memory_space<smem>>
    memref.store %12, %arg1[%c0_3, %c0_4] : memref<1x1xf32, #tpu.memory_space<smem>>
    return
  }
}

</mosaic_0001>

<bundles_post_ra>
// kernel: tpu_custom_call.1
= control target key start
LH: loop header
LB: loop body
LE: loop exit
PB: predicated region body
PF: predicated region fallthrough
CT: control target
= control target key end

     0   :  { %6 = vsyncpa [#allocation3], 0  ;;  %s144_s0 = inlined_call_operand.hbm [shape: f32[2,2], index: 0, kind: input, shape index: {}]   ;;  %s145_s1 = inlined_call_operand.hbm [shape: f32[1,1], index: 1, kind: output, shape index: {}]  }
   0x1   :  { %7 = vsyncpa [#allocation4], 0  ;;  %s108_s6 = smov [#allocation2]   ;;  %s72_s10 = scalar_lea.hbm %s144_s0, 32 }
   0x2   :  { %s14_s7 = sshll.u32 %s108_s6, 4  ;;  %p73_p0 = scmp.ne.s32.totalorder %s144_s0, %s72_s10  ;;  %s15_s7 = int_to_ptr.vmem [resolvable:$true] %s14_s7 }
   0x3   :  { %p76_p1 = scmp.lt.u32.totalorder %s72_s10, %s144_s0 }
   0x5   :  { %p78_p2 = pnand %p76_p1, %p73_p0 }
   0x7   :  { %81 = shalt.err (!%p78_p2)
}
   0x8   :  { %s82_s15 = scalar_lea.vmem %s15_s7, 32  ;;  %p87_p4 = scmp.lt.s32.totalorder %s15_s7, %s15_s7 }
   0x9   :  { %p83_p3 = scmp.ne.s32.totalorder %s15_s7, %s82_s15  ;;  %p88_p5 = scmp.lt.s32.totalorder %s82_s15, %s82_s15 }
   0xb   :  { %p89_p6 = por %p88_p5, %p87_p4 }
   0xd   :  { %p90_p7 = pnand %p89_p6, %p83_p3 }
   0xf   :  { %93 = shalt.err (!%p90_p7)
}
  0x10   :  { %17 = dma.hbm_to_vmem [thread:$0]  %s144_s0, 32, %s15_s7, [#allocation3]  }
  0x11   :  { %104 = dma.done.wait [#allocation3], 32  }
  0x12   :  { %105 = vsyncadd [#allocation3], 4294967264  ;;  %v22_v0 = vld [vmem:[#allocation2 + $0x1] sm:$0x1]  ;;  %v21_v4 = vld [vmem:[#allocation2] sm:$0x1] }
  0x13   :  { %v23_v1 = vmul.f32 %v22_v0, %v22_v0  ;;  %v24_v6 = vmul.f32 0.5, %v21_v4  ;;  %vm37_vm1 = vcmask 8192   ;;  %s94_s20 = scalar_lea.hbm %s145_s1, 16 }
  0x14   :  { %p95_p8 = scmp.ne.s32.totalorder %s145_s1, %s94_s20  ;;  %p98_p9 = scmp.lt.u32.totalorder %s94_s20, %s145_s1 }
  0x15   :  { %68 = vrcp.f32 %v23_v1  ;;  %v27_v2 = vadd.f32 1.0, %v23_v1  ;;  %v30_v3 = vmul.f32 -0.5, %v23_v1  ;;  %v33_v7 = vand.u32 2147483647, %v23_v1 }
  0x16   :  { %p100_p10 = pnand %p98_p9, %p95_p8 }
  0x17   :  { %70 = vlog2.f32 %v27_v2  ;;  %v31_v5 = vadd.f32 1.0, %v30_v3  ;;  %vm34_vm0 = vcmp.lt.f32.partialorder %v33_v7, 0.0004427343 }
  0x19   :  { %v32_v9 = vmul.f32 %v31_v5, %v23_v1 }
  0x1f   :  { %v69_v8 = vpop.eup %68 }
  0x20   :  { %v26_v11 = vmul.f32 %v69_v8, %v24_v6 }
  0x21   :  { %v71_v10 = vpop.eup %70 }
  0x22   :  { %v29_v12 = vmul.f32 0.6931472, %v71_v10 }
  0x24   :  { %v35_v13 = vsel %vm34_vm0, %v32_v9, %v29_v12 }
  0x25   :  { %v36_v14 = vadd.f32 %v35_v13, %v26_v11 }
  0x27   :  { %v38_v15 = vsel %vm37_vm1, %v36_v14, 0.0 }
  0x28   :  { %39 = vadd.xlane.f32.xlu0 %v38_v15 }
  0xb5   :  { %v40_v16 = vpop.xlane.xlu0 %39 }
  0xb6   :  { %v41_v17 = vrot.slane %v40_v16, 4 }
  0xb8   :  { %v42_v18 = vadd.f32 %v41_v17, %v40_v16 }
  0xba   :  { %v43_v19 = vrot.slane %v42_v18, 2 }
  0xbc   :  { %v44_v20 = vadd.f32 %v43_v19, %v42_v18 }
  0xbe   :  { %v45_v21 = vrot.slane %v44_v20, 1 }
  0xc0   :  { %v46_v22 = vadd.f32 %v45_v21, %v44_v20 }
  0xc2   :  { %64 = vpush %v46_v22 }
  0xf3   :  { %s65_s0 = spop %64 }
  0xf4   :  { %49 = sst [smem:[#allocation5]] %s65_s0 }
  0xf5   :  { %103 = shalt.err (!%p100_p10)
}
  0xf6   :  { %s109_s25 = smov [#allocation5]  }
  0xf7   :  { %57 = dma.smem_to_hbm %s109_s25, 16, %s145_s1, [#allocation4]  }
  0xf8   :  { %106 = dma.done.wait [#allocation4], 16  }
  0xf9   :  { %107 = vsyncadd [#allocation4], 4294967280 }
  0xfa   :  { %61 = sfence }
  0xfb   :  { %62 = vsyncpa [#allocation3], 1 }
  0xfc   :  { %63 = vsyncpa [#allocation4], 1 }

</bundles_post_ra>
